<compile_context>
chip_gen: v6e
topology: v6e:2x2x1
jax: 0.10.0
libtpu: 0.0.40
codegen_flags: <defaults>
</compile_context>

<pallas_src>
import jax
import jax.numpy as jnp
from jax.experimental import pallas as pl
from jax.experimental.pallas import tpu as pltpu  # noqa: F401  (kept for TPU-specific tuning hooks)


def _softplus(x):
    # numerically stable softplus using only jnp ops (lowers cleanly in Mosaic)
    return jnp.maximum(x, 0.0) + jnp.log1p(jnp.exp(-jnp.abs(x)))


def _mish(x):
    return x * jnp.tanh(_softplus(x))


def critic_kernel(s_ref, a_ref,
                  w1s_ref, w1a_ref, b1_ref,
                  w2_ref, b2_ref,
                  w3_ref, b3_ref,
                  w4_ref, b4_ref,
                  out_ref):
    # s_ref:  (B, S)          a_ref: (B, A)
    # w1s_ref:(S, Q*H)        w1a_ref:(A, Q*H)     b1_ref:(1, Q*H)
    # w2_ref/w3_ref:(Q*H,Q*H) block-diagonal       b2/b3:(1, Q*H)
    # w4_ref:(Q*H, Q) block-structured             b4_ref:(1, Q)
    # out_ref:(B, Q)
    s = s_ref[...]
    a = a_ref[...]

    # Layer 1: split matmul avoids materializing concat([state, action]) in HBM.
    h = jnp.dot(s, w1s_ref[...], preferred_element_type=jnp.float32)
    h = h + jnp.dot(a, w1a_ref[...], preferred_element_type=jnp.float32)
    h = _mish(h + b1_ref[...])

    # Hidden layers: single block-diagonal matmuls over all Q networks at once.
    h = _mish(jnp.dot(h, w2_ref[...], preferred_element_type=jnp.float32) + b2_ref[...])
    h = _mish(jnp.dot(h, w3_ref[...], preferred_element_type=jnp.float32) + b3_ref[...])

    # Output layer: directly produces the lane-dense (B, Q) result.
    out_ref[...] = (jnp.dot(h, w4_ref[...], preferred_element_type=jnp.float32)
                    + b4_ref[...])


def pack_critic_params(params, state_dim):
    """Pack per-network params (as produced by init_critic_params) into the
    lane-folded layout consumed by the kernel. Done once, outside the kernel."""
    w1, b1 = params["w1"], params["b1"]      # (Q, in, H), (Q, 1, H)
    w2, b2 = params["w2"], params["b2"]      # (Q, H, H),  (Q, 1, H)
    w3, b3 = params["w3"], params["b3"]
    w4, b4 = params["w4"], params["b4"]      # (Q, H, 1),  (Q, 1, 1)
    Q, in_dim, H = w1.shape
    QH = Q * H

    # Layer 1: (in, Q*H), split into state / action row blocks.
    w1p = jnp.transpose(w1, (1, 0, 2)).reshape(in_dim, QH)
    w1s_p = w1p[:state_dim]
    w1a_p = w1p[state_dim:]
    b1p = b1[:, 0, :].reshape(1, QH)

    # Hidden layers: block-diagonal (Q*H, Q*H).
    def block_diag(w):
        m = jnp.zeros((QH, QH), w.dtype)
        for q in range(Q):
            m = m.at[q * H:(q + 1) * H, q * H:(q + 1) * H].set(w[q])
        return m

    w2p = block_diag(w2)
    b2p = b2[:, 0, :].reshape(1, QH)
    w3p = block_diag(w3)
    b3p = b3[:, 0, :].reshape(1, QH)

    # Output layer: (Q*H, Q) block-structured -> dense (B, Q) output.
    w4p = jnp.zeros((QH, Q), w4.dtype)
    for q in range(Q):
        w4p = w4p.at[q * H:(q + 1) * H, q].set(w4[q, :, 0])
    b4p = b4[:, 0, 0].reshape(1, Q)

    return {"w1s": w1s_p, "w1a": w1a_p, "b1": b1p,
            "w2": w2p, "b2": b2p, "w3": w3p, "b3": b3p,
            "w4": w4p, "b4": b4p}


def critic_forward(state, action, packed):
    """Equivalent of Critic.forward: returns (B, num_q_networks) float32."""
    state = state.astype(jnp.float32)
    action = action.astype(jnp.float32)
    B = state.shape[0]
    Q = packed["w4"].shape[1]

    # Single invocation, no grid: all operands live fully in VMEM.
    return pl.pallas_call(
        critic_kernel,
        out_shape=jax.ShapeDtypeStruct((B, Q), jnp.float32),
    )(state, action,
      packed["w1s"], packed["w1a"], packed["b1"],
      packed["w2"], packed["b2"],
      packed["w3"], packed["b3"],
      packed["w4"], packed["b4"])


def init_critic_params(key, state_dim, action_dim, hidden_dim=32, num_q=5):
    """Deterministic init mimicking nn.Linear default (uniform ±1/sqrt(fan_in))."""
    in_dim = state_dim + action_dim
    dims = [(in_dim, hidden_dim), (hidden_dim, hidden_dim),
            (hidden_dim, hidden_dim), (hidden_dim, 1)]
    params = {}
    for layer_idx, (fan_in, fan_out) in enumerate(dims, start=1):
        key, kw, kb = jax.random.split(key, 3)
        bound = 1.0 / jnp.sqrt(fan_in)
        params[f"w{layer_idx}"] = jax.random.uniform(
            kw, (num_q, fan_in, fan_out), jnp.float32, -bound, bound)
        params[f"b{layer_idx}"] = jax.random.uniform(
            kb, (num_q, 1, fan_out), jnp.float32, -bound, bound)
    return params


def critic_forward_ref(state, action, params):
    """Pure-JAX reference for correctness checking (per-network loop)."""
    x = jnp.concatenate([state, action], axis=-1).astype(jnp.float32)
    Q = params["w1"].shape[0]
    outs = []
    for q in range(Q):
        h = _mish(x @ params["w1"][q] + params["b1"][q, 0])
        h = _mish(h @ params["w2"][q] + params["b2"][q, 0])
        h = _mish(h @ params["w3"][q] + params["b3"][q, 0])
        outs.append(h @ params["w4"][q] + params["b4"][q, 0])
    return jnp.concatenate(outs, axis=-1)


if __name__ == "__main__":
    B, STATE_DIM, ACTION_DIM, HIDDEN, NUM_Q = 8, 12, 4, 32, 5

    key = jax.random.PRNGKey(0)
    k_state, k_action, k_params = jax.random.split(key, 3)
    state = jax.random.normal(k_state, (B, STATE_DIM), jnp.float32)
    action = jax.random.normal(k_action, (B, ACTION_DIM), jnp.float32)
    params = init_critic_params(k_params, STATE_DIM, ACTION_DIM, HIDDEN, NUM_Q)
    packed = pack_critic_params(params, STATE_DIM)

    q_values = critic_forward(state, action, packed)
    q_values = jax.block_until_ready(q_values)

    q_ref = critic_forward_ref(state, action, params)
    assert q_values.shape == (B, NUM_Q), q_values.shape
    assert jnp.allclose(q_values, q_ref, atol=1e-5, rtol=1e-5), (
        float(jnp.max(jnp.abs(q_values - q_ref))))

    print("KERNEL_OK")
</pallas_src>

<mosaic_0001>
module attributes {stable_mosaic.version = 11 : i64} {
  func.func @critic_kernel(%arg0: memref<8x12xf32, #tpu.memory_space<vmem>>, %arg1: memref<8x4xf32, #tpu.memory_space<vmem>>, %arg2: memref<12x160xf32, #tpu.memory_space<vmem>>, %arg3: memref<4x160xf32, #tpu.memory_space<vmem>>, %arg4: memref<1x160xf32, #tpu.memory_space<vmem>>, %arg5: memref<160x160xf32, #tpu.memory_space<vmem>>, %arg6: memref<1x160xf32, #tpu.memory_space<vmem>>, %arg7: memref<160x160xf32, #tpu.memory_space<vmem>>, %arg8: memref<1x160xf32, #tpu.memory_space<vmem>>, %arg9: memref<160x5xf32, #tpu.memory_space<vmem>>, %arg10: memref<1x5xf32, #tpu.memory_space<vmem>>, %arg11: memref<8x5xf32, #tpu.memory_space<vmem>>) attributes {dimension_semantics = [], scalar_prefetch = 0 : i64, scratch_operands = 0 : i64, tpu.core_type = #tpu.core_type<tc>} {
    %c0 = arith.constant 0 : index
    %c0_0 = arith.constant 0 : index
    %0 = vector.load %arg0[%c0, %c0_0] : memref<8x12xf32, #tpu.memory_space<vmem>>, vector<8x12xf32>
    %c0_1 = arith.constant 0 : index
    %c0_2 = arith.constant 0 : index
    %1 = vector.load %arg1[%c0_1, %c0_2] : memref<8x4xf32, #tpu.memory_space<vmem>>, vector<8x4xf32>
    %c0_3 = arith.constant 0 : index
    %c0_4 = arith.constant 0 : index
    %2 = vector.load %arg2[%c0_3, %c0_4] : memref<12x160xf32, #tpu.memory_space<vmem>>, vector<12x160xf32>
    %cst = arith.constant dense<0.000000e+00> : vector<8x160xf32>
    %3 = tpu.matmul %0, %2, %cst {dimension_numbers = #tpu.dot_dimension_numbers<[1], [0], [0], [1], [0, 0, 1, 1], [], []>} : vector<8x12xf32>, vector<12x160xf32>, vector<8x160xf32> -> vector<8x160xf32>
    %c0_5 = arith.constant 0 : index
    %c0_6 = arith.constant 0 : index
    %4 = vector.load %arg3[%c0_5, %c0_6] : memref<4x160xf32, #tpu.memory_space<vmem>>, vector<4x160xf32>
    %cst_7 = arith.constant dense<0.000000e+00> : vector<8x160xf32>
    %5 = tpu.matmul %1, %4, %cst_7 {dimension_numbers = #tpu.dot_dimension_numbers<[1], [0], [0], [1], [0, 0, 1, 1], [], []>} : vector<8x4xf32>, vector<4x160xf32>, vector<8x160xf32> -> vector<8x160xf32>
    %6 = arith.addf %3, %5 : vector<8x160xf32>
    %c0_8 = arith.constant 0 : index
    %c0_9 = arith.constant 0 : index
    %7 = vector.load %arg4[%c0_8, %c0_9] : memref<1x160xf32, #tpu.memory_space<vmem>>, vector<1x160xf32>
    %8 = vector.broadcast %7 : vector<1x160xf32> to vector<8x160xf32>
    %9 = arith.addf %6, %8 : vector<8x160xf32>
    %cst_10 = arith.constant 0.000000e+00 : f32
    %10 = vector.broadcast %cst_10 : f32 to vector<8x160xf32>
    %11 = arith.maximumf %9, %10 : vector<8x160xf32>
    %12 = math.absf %9 : vector<8x160xf32>
    %cst_11 = arith.constant 0.000000e+00 : f32
    %13 = vector.broadcast %cst_11 : f32 to vector<8x160xf32>
    %14 = arith.subf %13, %12 : vector<8x160xf32>
    %15 = math.exp %14 : vector<8x160xf32>
    %16 = math.log1p %15 : vector<8x160xf32>
    %17 = arith.addf %11, %16 : vector<8x160xf32>
    %18 = math.tanh %17 : vector<8x160xf32>
    %19 = arith.mulf %9, %18 : vector<8x160xf32>
    %c0_12 = arith.constant 0 : index
    %c0_13 = arith.constant 0 : index
    %20 = vector.load %arg5[%c0_12, %c0_13] : memref<160x160xf32, #tpu.memory_space<vmem>>, vector<160x160xf32>
    %cst_14 = arith.constant dense<0.000000e+00> : vector<8x160xf32>
    %21 = tpu.matmul %19, %20, %cst_14 {dimension_numbers = #tpu.dot_dimension_numbers<[1], [0], [0], [1], [0, 0, 1, 1], [], []>} : vector<8x160xf32>, vector<160x160xf32>, vector<8x160xf32> -> vector<8x160xf32>
    %c0_15 = arith.constant 0 : index
    %c0_16 = arith.constant 0 : index
    %22 = vector.load %arg6[%c0_15, %c0_16] : memref<1x160xf32, #tpu.memory_space<vmem>>, vector<1x160xf32>
    %23 = vector.broadcast %22 : vector<1x160xf32> to vector<8x160xf32>
    %24 = arith.addf %21, %23 : vector<8x160xf32>
    %cst_17 = arith.constant 0.000000e+00 : f32
    %25 = vector.broadcast %cst_17 : f32 to vector<8x160xf32>
    %26 = arith.maximumf %24, %25 : vector<8x160xf32>
    %27 = math.absf %24 : vector<8x160xf32>
    %cst_18 = arith.constant 0.000000e+00 : f32
    %28 = vector.broadcast %cst_18 : f32 to vector<8x160xf32>
    %29 = arith.subf %28, %27 : vector<8x160xf32>
    %30 = math.exp %29 : vector<8x160xf32>
    %31 = math.log1p %30 : vector<8x160xf32>
    %32 = arith.addf %26, %31 : vector<8x160xf32>
    %33 = math.tanh %32 : vector<8x160xf32>
    %34 = arith.mulf %24, %33 : vector<8x160xf32>
    %c0_19 = arith.constant 0 : index
    %c0_20 = arith.constant 0 : index
    %35 = vector.load %arg7[%c0_19, %c0_20] : memref<160x160xf32, #tpu.memory_space<vmem>>, vector<160x160xf32>
    %cst_21 = arith.constant dense<0.000000e+00> : vector<8x160xf32>
    %36 = tpu.matmul %34, %35, %cst_21 {dimension_numbers = #tpu.dot_dimension_numbers<[1], [0], [0], [1], [0, 0, 1, 1], [], []>} : vector<8x160xf32>, vector<160x160xf32>, vector<8x160xf32> -> vector<8x160xf32>
    %c0_22 = arith.constant 0 : index
    %c0_23 = arith.constant 0 : index
    %37 = vector.load %arg8[%c0_22, %c0_23] : memref<1x160xf32, #tpu.memory_space<vmem>>, vector<1x160xf32>
    %38 = vector.broadcast %37 : vector<1x160xf32> to vector<8x160xf32>
    %39 = arith.addf %36, %38 : vector<8x160xf32>
    %cst_24 = arith.constant 0.000000e+00 : f32
    %40 = vector.broadcast %cst_24 : f32 to vector<8x160xf32>
    %41 = arith.maximumf %39, %40 : vector<8x160xf32>
    %42 = math.absf %39 : vector<8x160xf32>
    %cst_25 = arith.constant 0.000000e+00 : f32
    %43 = vector.broadcast %cst_25 : f32 to vector<8x160xf32>
    %44 = arith.subf %43, %42 : vector<8x160xf32>
    %45 = math.exp %44 : vector<8x160xf32>
    %46 = math.log1p %45 : vector<8x160xf32>
    %47 = arith.addf %41, %46 : vector<8x160xf32>
    %48 = math.tanh %47 : vector<8x160xf32>
    %49 = arith.mulf %39, %48 : vector<8x160xf32>
    %c0_26 = arith.constant 0 : index
    %c0_27 = arith.constant 0 : index
    %50 = vector.load %arg9[%c0_26, %c0_27] : memref<160x5xf32, #tpu.memory_space<vmem>>, vector<160x5xf32>
    %cst_28 = arith.constant dense<0.000000e+00> : vector<8x5xf32>
    %51 = tpu.matmul %49, %50, %cst_28 {dimension_numbers = #tpu.dot_dimension_numbers<[1], [0], [0], [1], [0, 0, 1, 1], [], []>} : vector<8x160xf32>, vector<160x5xf32>, vector<8x5xf32> -> vector<8x5xf32>
    %c0_29 = arith.constant 0 : index
    %c0_30 = arith.constant 0 : index
    %52 = vector.load %arg10[%c0_29, %c0_30] : memref<1x5xf32, #tpu.memory_space<vmem>>, vector<1x5xf32>
    %53 = vector.broadcast %52 : vector<1x5xf32> to vector<8x5xf32>
    %54 = arith.addf %51, %53 : vector<8x5xf32>
    %c0_31 = arith.constant 0 : index
    %c0_32 = arith.constant 0 : index
    %55 = vector.load %arg11[%c0_31, %c0_32] : memref<8x5xf32, #tpu.memory_space<vmem>>, vector<8x5xf32>
    tpu.vector_store %arg11[%c0_31, %c0_32], %54 {strides = array<i32>} : memref<8x5xf32, #tpu.memory_space<vmem>>, vector<8x5xf32>,
    return
  }
}

</mosaic_0001>

<bundles_post_ra>
// kernel: tpu_custom_call.1
= control target key start
LH: loop header
LB: loop body
LE: loop exit
PB: predicated region body
PF: predicated region fallthrough
CT: control target
= control target key end

     0   :  { %16 = vsyncpa [#allocation3], 0  ;;  %s1046_s0 = inlined_call_operand.vmem [shape: f32[8,12], index: 0, kind: input, shape index: {}]   ;;  %s1047_s1 = inlined_call_operand.vmem [shape: f32[8,4], index: 1, kind: input, shape index: {}]   ;;  %s1048_s2 = inlined_call_operand.vmem [shape: f32[12,160], index: 2, kind: input, shape index: {}]   ;;  %s1049_s3 = inlined_call_operand.vmem [shape: f32[4,160], index: 3, kind: input, shape index: {}]   ;;  %s1050_s4 = inlined_call_operand.vmem [shape: f32[1,160], index: 4, kind: input, shape index: {}]   ;;  %s1051_s5 = inlined_call_operand.hbm [shape: f32[160,160], index: 5, kind: input, shape index: {}]   ;;  %s1052_s6 = inlined_call_operand.vmem [shape: f32[1,160], index: 6, kind: input, shape index: {}]   ;;  %s1053_s7 = inlined_call_operand.hbm [shape: f32[160,160], index: 7, kind: input, shape index: {}]   ;;  %s1054_s8 = inlined_call_operand.vmem [shape: f32[1,160], index: 8, kind: input, shape index: {}]   ;;  %s1055_s9 = inlined_call_operand.vmem [shape: f32[160,5], index: 9, kind: input, shape index: {}]   ;;  %s1056_s10 = inlined_call_operand.vmem [shape: f32[1,5], index: 10, kind: input, shape index: {}]   ;;  %s1057_s11 = inlined_call_operand.hbm [shape: f32[8,5], index: 11, kind: output, shape index: {}]  }
   0x1   :  { %17 = vsyncpa [#allocation6], 0 }
   0x2   :  { %18 = vsyncpa [#allocation4], 0  ;;  %s843_s17 = smov [#allocation2]  }
   0x3   :  { %s34_s18 = sshll.u32 %s843_s17, 4  ;;  %s35_s18 = int_to_ptr.vmem [resolvable:$true] %s34_s18 }
   0x4   :  { %s785_s19 = scalar_lea.vmem %s35_s18, 5120  ;;  %p790_p1 = scmp.lt.s32.totalorder %s35_s18, %s35_s18 }
   0x5   :  { %p786_p0 = scmp.ne.s32.totalorder %s35_s18, %s785_s19  ;;  %p791_p2 = scmp.lt.s32.totalorder %s785_s19, %s785_s19 }
   0x7   :  { %p792_p3 = por %p791_p2, %p790_p1 }
   0x9   :  { %p793_p4 = pnand %p792_p3, %p786_p0 }
   0xb   :  { %796 = shalt.err (!%p793_p4)
}
   0xc   :  { %s844_s20 = smov 256   ;;  %s845_s21 = smov 16  }
   0xd   :  { %40 = dma.hbm_to_vmem [thread:$0]  %s1051_s5, 5120, %s35_s18, [#allocation3], %s844_s20, %s844_s20, %s845_s21  }
   0xe   :  { %s846_s24 = smov [#allocation5]  }
   0xf   :  { %s48_s25 = sshll.u32 %s846_s24, 4  ;;  %s49_s25 = int_to_ptr.vmem [resolvable:$true] %s48_s25 }
  0x10   :  { %s805_s26 = scalar_lea.vmem %s49_s25, 5120  ;;  %p810_p6 = scmp.lt.s32.totalorder %s49_s25, %s49_s25 }
  0x11   :  { %p806_p5 = scmp.ne.s32.totalorder %s49_s25, %s805_s26  ;;  %p811_p7 = scmp.lt.s32.totalorder %s805_s26, %s805_s26 }
  0x13   :  { %p812_p8 = por %p811_p7, %p810_p6 }
  0x15   :  { %p813_p9 = pnand %p812_p8, %p806_p5 }
  0x17   :  { %816 = shalt.err (!%p813_p9)
}
  0x18   :  { %54 = dma.hbm_to_vmem [thread:$0]  %s1053_s7, 5120, %s49_s25, [#allocation6], %s844_s20, %s844_s20, %s845_s21  }
  0x19   :  { %837 = dma.done.wait [#allocation3], 5120  }
  0x1a   :  { %838 = vsyncadd [#allocation3], 4294962176 }
  0x1b   :  { %839 = dma.done.wait [#allocation6], 5120  }
  0x1c   :  { %840 = vsyncadd [#allocation6], 4294962176  ;;  %v847_v0 = vmov 0.0   ;;  %v73_v1 = vld [vmem:[%s1049_s3] sm:$0xff]  ;;  %vm80_vm0 = vcmask 1043456   ;;  %vm76_vm1 = vcmask 31744   ;;  %v239_v49 = vlaneseq }
  0x1d   :  { %149 = vmatprep.mubr.f32.mxu1 %v847_v0  ;;  %v75_v2 = vcombine.high %v73_v1, %v73_v1  ;;  %v68_v3 = vld [vmem:[%s1047_s1] sm:$0xff]  ;;  %v72_v4 = vld [vmem:[%s1048_s2 + $0x18] sm:$0xf]  ;;  %v71_v5 = vld [vmem:[%s1048_s2 + $0x10] sm:$0xf]  ;;  %vm156_vm2 = vcmask 97280  }
  0x1e   :  { %v70_v6 = vld [vmem:[%s1048_s2 + $0x8] sm:$0xff]  ;;  %v69_v7 = vld [vmem:[%s1048_s2] sm:$0xff]  ;;  %v316_v9 = vld [vmem:[#allocation2 + $0xf8] sm:$0xff]  ;;  %v240_v50 = vshrl.u32 %v239_v49, 7  ;;  %vm337_vm5 = vcmask 261120   ;;  %s848_s14 = smov [#allocation7]  }
  0x1f   :  { %724 = vmatprep.subr.msk.mxu1 %vm80_vm0, %v75_v2  ;;  %v67_v8 = vld [vmem:[%s1046_s0] sm:$0xff]  ;;  %341 = vmatprep.subr.mxu0 %v316_v9  ;;  %v315_v10 = vld [vmem:[#allocation2 + $0xf0] sm:$0xff]  ;;  %v314_v11 = vld [vmem:[#allocation2 + $0xe8] sm:$0xff]  ;;  %s714_s15 = sshll.u32 %s848_s14, 4  ;;  %vm706_vm10 = vcmask 39936   ;;  %s715_s15 = int_to_ptr.vmem [resolvable:$true] %s714_s15 }
  0x20   :  { %725 = vmatpush1.msk.msra.mxu1 %vm80_vm0, %v73_v1  ;;  %342 = vmatpush1.msra.mxu0 %v315_v10  ;;  %v313_v12 = vld [vmem:[#allocation2 + $0xe0] sm:$0xff]  ;;  %v312_v13 = vld [vmem:[#allocation2 + $0xd8] sm:$0xff]  ;;  %v311_v14 = vld [vmem:[#allocation2 + $0xd0] sm:$0xff]  ;;  %v939_v51 = vsub.s32 0, %v240_v50  ;;  %v944_v54 = vsub.s32 1, %v240_v50  ;;  %s817_s16 = scalar_lea.vmem %s715_s15, 128  ;;  %p822_p11 = scmp.lt.s32.totalorder %s715_s15, %s715_s15 }
  0x21   :  { %726 = vmatmul.mubr.msk.f32.vlgmr.msra.gmra.mxu1 %vm76_vm1, %v68_v3  ;;  %727 = vmatprep.subr.msk.mxu1 %vm80_vm0, %v72_v4  ;;  %v310_v15 = vld [vmem:[#allocation2 + $0xc8] sm:$0xff]  ;;  %v309_v16 = vld [vmem:[#allocation2 + $0xc0] sm:$0xff]  ;;  %v308_v17 = vld [vmem:[#allocation2 + $0xb8] sm:$0xff]  ;;  %p818_p10 = scmp.ne.s32.totalorder %s715_s15, %s817_s16  ;;  %p823_p12 = scmp.lt.s32.totalorder %s817_s16, %s817_s16 }
  0x22   :  { %728 = vmatpush1.msk.msra.mxu1 %vm80_vm0, %v71_v5  ;;  %230 = vmatprep.mubr.f32.mxu1 %v847_v0  ;;  %v307_v18 = vld [vmem:[#allocation2 + $0xb0] sm:$0xff]  ;;  %v306_v19 = vld [vmem:[#allocation2 + $0xa8] sm:$0xff]  ;;  %v305_v20 = vld [vmem:[#allocation2 + $0xa0] sm:$0xff] }
  0x23   :  { %196 = vmatprep.subr.mxu1 %v70_v6  ;;  %343 = vmatprep.subr.mxu0 %v314_v11  ;;  %v304_v21 = vld [vmem:[#allocation2 + $0x98] sm:$0xff]  ;;  %v303_v22 = vld [vmem:[#allocation2 + $0x90] sm:$0xff]  ;;  %v302_v23 = vld [vmem:[#allocation2 + $0x88] sm:$0xff]  ;;  %p824_p13 = por %p823_p12, %p822_p11 }
  0x24   :  { %197 = vmatpush1.msra.mxu1 %v69_v7  ;;  %344 = vmatpush1.msra.mxu0 %v313_v12  ;;  %v301_v24 = vld [vmem:[#allocation2 + $0x80] sm:$0xff]  ;;  %v300_v25 = vld [vmem:[#allocation2 + $0x78] sm:$0xff]  ;;  %v299_v26 = vld [vmem:[#allocation2 + $0x70] sm:$0xff] }
  0x25   :  { %729 = vmatmul.mubr.msk.f32.vlgmr.msra.gmra.mxu1 %vm156_vm2, %v67_v8  ;;  %345 = vmatprep.subr.mxu0 %v312_v13  ;;  %v298_v27 = vld [vmem:[#allocation2 + $0x68] sm:$0xff]  ;;  %v297_v28 = vld [vmem:[#allocation2 + $0x60] sm:$0xff]  ;;  %v296_v29 = vld [vmem:[#allocation2 + $0x58] sm:$0xff]  ;;  %p825_p0 = pnand %p824_p13, %p818_p10 }
  0x26   :  { %346 = vmatpush1.msra.mxu0 %v311_v14  ;;  %v295_v30 = vld [vmem:[#allocation2 + $0x50] sm:$0xff]  ;;  %v294_v31 = vld [vmem:[#allocation2 + $0x48] sm:$0xff]  ;;  %v293_v32 = vld [vmem:[#allocation2 + $0x40] sm:$0xff] }
  0x27   :  { %347 = vmatprep.subr.mxu0 %v310_v15  ;;  %v292_v33 = vld [vmem:[#allocation2 + $0x38] sm:$0xff]  ;;  %v291_v34 = vld [vmem:[#allocation2 + $0x30] sm:$0xff]  ;;  %v290_v35 = vld [vmem:[#allocation2 + $0x28] sm:$0xff] }
  0x28   :  { %348 = vmatpush1.msra.mxu0 %v309_v16  ;;  %v289_v36 = vld [vmem:[#allocation2 + $0x20] sm:$0xff]  ;;  %v288_v37 = vld [vmem:[#allocation2 + $0x18] sm:$0xff]  ;;  %v287_v38 = vld [vmem:[#allocation2 + $0x10] sm:$0xff] }
  0x29   :  { %349 = vmatprep.subr.mxu0 %v308_v17  ;;  %v286_v39 = vld [vmem:[#allocation2 + $0x8] sm:$0xff]  ;;  %v285_v40 = vld [vmem:[#allocation2] sm:$0xff]  ;;  %v324_v41 = vld [vmem:[#allocation2 + $0x138] sm:$0xff] }
  0x2a   :  { %350 = vmatpush1.msra.mxu0 %v307_v18  ;;  %v323_v42 = vld [vmem:[#allocation2 + $0x130] sm:$0xff]  ;;  %v322_v43 = vld [vmem:[#allocation2 + $0x128] sm:$0xff]  ;;  %v321_v44 = vld [vmem:[#allocation2 + $0x120] sm:$0xff] }
  0x2b   :  { %351 = vmatprep.subr.mxu0 %v306_v19  ;;  %v320_v45 = vld [vmem:[#allocation2 + $0x118] sm:$0xff]  ;;  %v319_v46 = vld [vmem:[#allocation2 + $0x110] sm:$0xff]  ;;  %v318_v47 = vld [vmem:[#allocation2 + $0x108] sm:$0xff] }
  0x2c   :  { %352 = vmatpush1.msra.mxu0 %v305_v20  ;;  %v317_v48 = vld [vmem:[#allocation2 + $0x100] sm:$0xff]  ;;  %v461_v49 = vld [vmem:[#allocation5 + $0x78] sm:$0xff]  ;;  %v460_v50 = vld [vmem:[#allocation5 + $0x70] sm:$0xff] }
  0x2d   :  { %353 = vmatprep.subr.mxu0 %v304_v21  ;;  %v237_v53 = vld [vmem:[%s1050_s4] sm:$0x3] }
  0x2e   :  { %354 = vmatpush1.msra.mxu0 %v303_v22  ;;  %v242_v56 = vrot.slane %v237_v53, %v939_v51  ;;  %v246_v59 = vrot.slane %v237_v53, %v944_v54  ;;  %v458_v53 = vld [vmem:[#allocation5 + $0x60] sm:$0xff] }
  0x2f   :  { %355 = vmatprep.subr.mxu0 %v302_v23 }
  0x30   :  { %356 = vmatpush1.msra.mxu0 %v301_v24 }
  0x31   :  { %357 = vmatprep.subr.mxu0 %v300_v25 }
  0x32   :  { %358 = vmatpush1.msra.mxu0 %v299_v26 }
  0x33   :  { %359 = vmatprep.subr.mxu0 %v298_v27 }
  0x34   :  { %360 = vmatpush1.msra.mxu0 %v297_v28 }
  0x35   :  { %361 = vmatprep.subr.mxu0 %v296_v29 }
  0x36   :  { %362 = vmatpush1.msra.mxu0 %v295_v30 }
  0x37   :  { %363 = vmatprep.subr.mxu0 %v294_v31 }
  0x38   :  { %364 = vmatpush1.msra.mxu0 %v293_v32 }
  0x39   :  { %365 = vmatprep.subr.mxu0 %v292_v33  ;;  %v477_v33 = vld [vmem:[#allocation5 + $0xf8] sm:$0xff] }
  0x3a   :  { %366 = vmatpush1.msra.mxu0 %v291_v34  ;;  %501 = vmatprep.subr.mxu1 %v477_v33  ;;  %v476_v34 = vld [vmem:[#allocation5 + $0xf0] sm:$0xff] }
  0x3b   :  { %367 = vmatprep.subr.mxu0 %v290_v35  ;;  %502 = vmatpush1.msra.mxu1 %v476_v34  ;;  %v475_v35 = vld [vmem:[#allocation5 + $0xe8] sm:$0xff] }
  0x3c   :  { %368 = vmatpush1.msra.mxu0 %v289_v36  ;;  %503 = vmatprep.subr.mxu1 %v475_v35  ;;  %v474_v36 = vld [vmem:[#allocation5 + $0xe0] sm:$0xff] }
  0x3d   :  { %369 = vmatprep.subr.mxu0 %v288_v37  ;;  %504 = vmatpush1.msra.mxu1 %v474_v36  ;;  %v473_v37 = vld [vmem:[#allocation5 + $0xd8] sm:$0xff] }
  0x3e   :  { %370 = vmatpush1.msra.mxu0 %v287_v38  ;;  %505 = vmatprep.subr.mxu1 %v473_v37  ;;  %v472_v38 = vld [vmem:[#allocation5 + $0xd0] sm:$0xff] }
  0x3f   :  { %371 = vmatprep.subr.mxu0 %v286_v39  ;;  %506 = vmatpush1.msra.mxu1 %v472_v38  ;;  %v471_v39 = vld [vmem:[#allocation5 + $0xc8] sm:$0xff] }
  0x40   :  { %372 = vmatpush1.msra.mxu0 %v285_v40  ;;  %507 = vmatprep.subr.mxu1 %v471_v39  ;;  %v470_v40 = vld [vmem:[#allocation5 + $0xc0] sm:$0xff] }
  0x41   :  { %397 = vmatprep.subr.mxu0 %v324_v41  ;;  %508 = vmatpush1.msra.mxu1 %v470_v40  ;;  %v469_v41 = vld [vmem:[#allocation5 + $0xb8] sm:$0xff] }
  0x42   :  { %398 = vmatpush2.msra.mxu0 %v323_v42  ;;  %509 = vmatprep.subr.mxu1 %v469_v41  ;;  %v468_v42 = vld [vmem:[#allocation5 + $0xb0] sm:$0xff] }
  0x43   :  { %399 = vmatprep.subr.mxu0 %v322_v43  ;;  %510 = vmatpush1.msra.mxu1 %v468_v42  ;;  %v467_v43 = vld [vmem:[#allocation5 + $0xa8] sm:$0xff] }
  0x44   :  { %400 = vmatpush2.msra.mxu0 %v321_v44  ;;  %511 = vmatprep.subr.mxu1 %v467_v43  ;;  %v466_v44 = vld [vmem:[#allocation5 + $0xa0] sm:$0xff] }
  0x45   :  { %401 = vmatprep.subr.mxu0 %v320_v45  ;;  %512 = vmatpush1.msra.mxu1 %v466_v44  ;;  %v465_v45 = vld [vmem:[#allocation5 + $0x98] sm:$0xff] }
  0x46   :  { %402 = vmatpush2.msra.mxu0 %v319_v46  ;;  %513 = vmatprep.subr.mxu1 %v465_v45  ;;  %v464_v46 = vld [vmem:[#allocation5 + $0x90] sm:$0xff] }
  0x47   :  { %403 = vmatprep.subr.mxu0 %v318_v47  ;;  %514 = vmatpush1.msra.mxu1 %v464_v46  ;;  %v463_v47 = vld [vmem:[#allocation5 + $0x88] sm:$0xff] }
  0x48   :  { %404 = vmatpush2.msra.mxu0 %v317_v48  ;;  %515 = vmatprep.subr.mxu1 %v463_v47  ;;  %v462_v48 = vld [vmem:[#allocation5 + $0x80] sm:$0xff] }
  0x49   :  { %636 = vmatprep.subr.mxu0 %v847_v0  ;;  %516 = vmatpush1.msra.mxu1 %v462_v48 }
  0x4a   :  { %517 = vmatprep.subr.mxu1 %v461_v49 }
  0x4b   :  { %518 = vmatpush1.msra.mxu1 %v460_v50 }
  0xe1   :  { %v151_v52 = vpop.f32.mrf.mxu1 }
  0xe3   :  { %v153_v55 = vpop.f32.mrf.mxu1 }
  0xe5   :  { %v232_v57 = vpop.f32.mrf.mxu1 }
  0xe6   :  { %v233_v58 = vadd.f32 %v232_v57, %v151_v52  ;;  %v459_v52 = vld [vmem:[#allocation5 + $0x68] sm:$0xff] }
  0xe7   :  { %v234_v60 = vpop.f32.mrf.mxu1  ;;  %519 = vmatprep.subr.mxu1 %v459_v52  ;;  %v455_v57 = vld [vmem:[#allocation5 + $0x48] sm:$0xff]  ;;  %v621_v52 = vld [vmem:[%s1055_s9 + $0x78] sm:$0xff] }
  0xe8   :  { %v249_v61 = vadd.f32 %v242_v56, %v233_v58  ;;  %v235_v62 = vadd.f32 %v234_v60, %v153_v55  ;;  %520 = vmatpush1.msra.mxu1 %v458_v53  ;;  %v457_v55 = vld [vmem:[#allocation5 + $0x58] sm:$0xff]  ;;  %v456_v56 = vld [vmem:[#allocation5 + $0x50] sm:$0xff]  ;;  %v454_v58 = vld [vmem:[#allocation5 + $0x40] sm:$0xff] }
  0xe9   :  { %521 = vmatprep.subr.mxu1 %v457_v55  ;;  %v452_v60 = vld [vmem:[#allocation5 + $0x30] sm:$0xff]  ;;  %v619_v55 = vld [vmem:[%s1055_s9 + $0x68] sm:$0xff] }
  0xea   :  { %v253_v63 = vand.u32 2147483647, %v249_v61  ;;  %v250_v1 = vadd.f32 %v246_v59, %v235_v62  ;;  %v251_v21 = vmax.f32 %v249_v61, 0.0  ;;  %522 = vmatpush1.msra.mxu1 %v456_v56  ;;  %v453_v59 = vld [vmem:[#allocation5 + $0x38] sm:$0xff]  ;;  %v450_v62 = vld [vmem:[#allocation5 + $0x20] sm:$0xff]  ;;  %v620_v53 = vld [vmem:[%s1055_s9 + $0x70] sm:$0xff] }
  0xeb   :  { %523 = vmatprep.subr.mxu1 %v455_v57  ;;  %v618_v56 = vld [vmem:[%s1055_s9 + $0x60] sm:$0xff]  ;;  %v617_v57 = vld [vmem:[%s1055_s9 + $0x58] sm:$0xff] }
  0xec   :  { %v255_v2 = vsub.f32 0.0, %v253_v63  ;;  %v254_v3 = vand.u32 2147483647, %v250_v1  ;;  %v252_v26 = vmax.f32 %v250_v1, 0.0  ;;  %524 = vmatpush1.msra.mxu1 %v454_v58  ;;  %v449_v63 = vld [vmem:[#allocation5 + $0x18] sm:$0xff]  ;;  %v616_v58 = vld [vmem:[%s1055_s9 + $0x50] sm:$0xff] }
  0xed   :  { %525 = vmatprep.subr.mxu1 %v453_v59  ;;  %v615_v59 = vld [vmem:[%s1055_s9 + $0x48] sm:$0xff] }
  0xee   :  { %v257_v4 = vmul.f32 1.442695, %v255_v2  ;;  %v256_v5 = vsub.f32 0.0, %v254_v3  ;;  %526 = vmatpush1.msra.mxu1 %v452_v60  ;;  %v447_v2 = vld [vmem:[#allocation5 + $0x8] sm:$0xff]  ;;  %v446_v3 = vld [vmem:[#allocation5] sm:$0xff] }
  0xef   :  { %v614_v60 = vld [vmem:[%s1055_s9 + $0x40] sm:$0xff] }
  0xf0   :  { %741 = vpow2.f32 %v257_v4  ;;  %v259_v6 = vmul.f32 1.442695, %v256_v5  ;;  %v485_v4 = vld [vmem:[#allocation5 + $0x138] sm:$0xff]  ;;  %v484_v5 = vld [vmem:[#allocation5 + $0x130] sm:$0xff] }
  0xf2   :  { %743 = vpow2.f32 %v259_v6  ;;  %v483_v6 = vld [vmem:[#allocation5 + $0x128] sm:$0xff] }
  0xfd   :  { %v742_v7 = vpop.eup %741 }
  0xfe   :  { %v261_v8 = vadd.f32 1.0, %v742_v7  ;;  %v264_v11 = vmul.f32 -0.5, %v742_v7  ;;  %v267_v14 = vand.u32 2147483647, %v742_v7 }
  0xff   :  { %v744_v9 = vpop.eup %743 }
 0x100   :  { %745 = vlog2.f32 %v261_v8  ;;  %v270_v10 = vadd.f32 1.0, %v744_v9  ;;  %v273_v12 = vmul.f32 -0.5, %v744_v9  ;;  %v265_v13 = vadd.f32 1.0, %v264_v11  ;;  %v481_v8 = vld [vmem:[#allocation5 + $0x118] sm:$0xff]  ;;  %v478_v11 = vld [vmem:[#allocation5 + $0x100] sm:$0xff] }
 0x101   :  { %v276_v17 = vand.u32 2147483647, %v744_v9  ;;  %vm268_vm3 = vcmp.lt.f32.partialorder %v267_v14, 0.0004427343 }
 0x102   :  { %747 = vlog2.f32 %v270_v10  ;;  %v274_v15 = vadd.f32 1.0, %v273_v12  ;;  %v266_v19 = vmul.f32 %v742_v7, %v265_v13  ;;  %v482_v7 = vld [vmem:[#allocation5 + $0x120] sm:$0xff]  ;;  %v479_v10 = vld [vmem:[#allocation5 + $0x108] sm:$0xff] }
 0x103   :  { %vm277_vm4 = vcmp.lt.f32.partialorder %v276_v17, 0.0004427343  ;;  %v325_v12 = vld [vmem:[%s1052_s6] sm:$0x3] }
 0x104   :  { %v275_v24 = vmul.f32 %v744_v9, %v274_v15  ;;  %v480_v9 = vld [vmem:[#allocation5 + $0x110] sm:$0xff]  ;;  %v330_v13 = vrot.slane %v325_v12, %v939_v51  ;;  %v334_v14 = vrot.slane %v325_v12, %v944_v54 }
 0x10d   :  { %v746_v16 = vpop.eup %745 }
 0x10e   :  { %v263_v18 = vmul.f32 0.6931472, %v746_v16 }
 0x10f   :  { %v748_v20 = vpop.eup %747 }
 0x110   :  { %v269_v22 = vsel %vm268_vm3, %v266_v19, %v263_v18  ;;  %v272_v23 = vmul.f32 0.6931472, %v748_v20 }
 0x111   :  { %v279_v25 = vadd.f32 %v269_v22, %v251_v21 }
 0x112   :  { %v278_v27 = vsel %vm277_vm4, %v275_v24, %v272_v23 }
 0x113   :  { %v280_v28 = vadd.f32 %v278_v27, %v252_v26  ;;  %749 = vtanh.f32 %v279_v25 }
 0x115   :  { %751 = vtanh.f32 %v280_v28 }
 0x120   :  { %v750_v29 = vpop.eup %749 }
 0x121   :  { %v283_v32 = vmul.f32 %v750_v29, %v249_v61  ;;  %v451_v61 = vld [vmem:[#allocation5 + $0x28] sm:$0xff] }
 0x122   :  { %v752_v30 = vpop.eup %751  ;;  %527 = vmatprep.subr.mxu1 %v451_v61  ;;  %v613_v61 = vld [vmem:[%s1055_s9 + $0x38] sm:$0xff] }
 0x123   :  { %v284_v31 = vmul.f32 %v752_v30, %v250_v1  ;;  %528 = vmatpush1.msra.mxu1 %v450_v62  ;;  %v448_v1 = vld [vmem:[#allocation5 + $0x10] sm:$0xff] }
 0x124   :  { %529 = vmatprep.subr.mxu1 %v449_v63  ;;  %v612_v62 = vld [vmem:[%s1055_s9 + $0x30] sm:$0xff]  ;;  %v611_v63 = vld [vmem:[%s1055_s9 + $0x28] sm:$0xff] }
 0x125   :  { %730 = vmatprep.mubr.msk.f32.mxu0 %vm337_vm5, %v284_v31  ;;  %530 = vmatpush1.msra.mxu1 %v448_v1  ;;  %v610_v1 = vld [vmem:[%s1055_s9 + $0x20] sm:$0xff] }
 0x126   :  { %406 = vmatmul.mubr.f32.vlgmr.msra.gmra.mxu0 %v283_v32  ;;  %531 = vmatprep.subr.mxu1 %v447_v2  ;;  %v609_v2 = vld [vmem:[%s1055_s9 + $0x18] sm:$0xff] }
 0x127   :  { %532 = vmatpush1.msra.mxu1 %v446_v3  ;;  %637 = vmatpush1.msra.mxu0 %v621_v52  ;;  %v608_v3 = vld [vmem:[%s1055_s9 + $0x10] sm:$0xff] }
 0x128   :  { %557 = vmatprep.subr.mxu1 %v485_v4  ;;  %638 = vmatprep.subr.mxu0 %v847_v0  ;;  %v607_v4 = vld [vmem:[%s1055_s9 + $0x8] sm:$0xff] }
 0x129   :  { %558 = vmatpush2.msra.mxu1 %v484_v5  ;;  %639 = vmatpush1.msra.mxu0 %v620_v53  ;;  %v606_v5 = vld [vmem:[%s1055_s9] sm:$0xff] }
 0x12a   :  { %559 = vmatprep.subr.mxu1 %v483_v6  ;;  %640 = vmatprep.subr.mxu0 %v847_v0  ;;  %v625_v6 = vld [vmem:[%s1055_s9 + $0x98] sm:$0xff] }
 0x12b   :  { %560 = vmatpush2.msra.mxu1 %v482_v7  ;;  %641 = vmatpush1.msra.mxu0 %v619_v55  ;;  %v624_v7 = vld [vmem:[%s1055_s9 + $0x90] sm:$0xff] }
 0x12c   :  { %561 = vmatprep.subr.mxu1 %v481_v8  ;;  %642 = vmatprep.subr.mxu0 %v847_v0  ;;  %v623_v8 = vld [vmem:[%s1055_s9 + $0x88] sm:$0xff] }
 0x12d   :  { %562 = vmatpush2.msra.mxu1 %v480_v9  ;;  %643 = vmatpush1.msra.mxu0 %v618_v56  ;;  %v622_v9 = vld [vmem:[%s1055_s9 + $0x80] sm:$0xff] }
 0x12e   :  { %563 = vmatprep.subr.mxu1 %v479_v10  ;;  %644 = vmatprep.subr.mxu0 %v847_v0  ;;  %v486_v10 = vld [vmem:[%s1054_s8] sm:$0x3] }
 0x12f   :  { %564 = vmatpush2.msra.mxu1 %v478_v11  ;;  %645 = vmatpush1.msra.mxu0 %v617_v57  ;;  %v491_v11 = vrot.slane %v486_v10, %v939_v51  ;;  %v495_v12 = vrot.slane %v486_v10, %v944_v54 }
 0x130   :  { %646 = vmatprep.subr.mxu0 %v847_v0 }
 0x131   :  { %647 = vmatpush1.msra.mxu0 %v616_v58 }
 0x132   :  { %648 = vmatprep.subr.mxu0 %v847_v0 }
 0x133   :  { %649 = vmatpush1.msra.mxu0 %v615_v59 }
 0x134   :  { %650 = vmatprep.subr.mxu0 %v847_v0 }
 0x135   :  { %651 = vmatpush1.msra.mxu0 %v614_v60 }
 0x136   :  { %652 = vmatprep.subr.mxu0 %v847_v0 }
 0x137   :  { %653 = vmatpush1.msra.mxu0 %v613_v61 }
 0x138   :  { %654 = vmatprep.subr.mxu0 %v847_v0 }
 0x139   :  { %655 = vmatpush1.msra.mxu0 %v612_v62 }
 0x13a   :  { %656 = vmatprep.subr.mxu0 %v847_v0 }
 0x13b   :  { %657 = vmatpush1.msra.mxu0 %v611_v63 }
 0x13c   :  { %658 = vmatprep.subr.mxu0 %v847_v0 }
 0x13d   :  { %659 = vmatpush1.msra.mxu0 %v610_v1 }
 0x13e   :  { %660 = vmatprep.subr.mxu0 %v847_v0 }
 0x13f   :  { %661 = vmatpush1.msra.mxu0 %v609_v2 }
 0x140   :  { %662 = vmatprep.subr.mxu0 %v847_v0 }
 0x141   :  { %663 = vmatpush1.msra.mxu0 %v608_v3 }
 0x142   :  { %664 = vmatprep.subr.mxu0 %v847_v0 }
 0x143   :  { %665 = vmatpush1.msra.mxu0 %v607_v4 }
 0x144   :  { %666 = vmatprep.subr.mxu0 %v847_v0 }
 0x145   :  { %667 = vmatpush1.msra.mxu0 %v606_v5 }
 0x146   :  { %692 = vmatprep.subr.mxu0 %v847_v0 }
 0x147   :  { %693 = vmatpush2.msra.mxu0 %v625_v6 }
 0x148   :  { %694 = vmatprep.subr.mxu0 %v847_v0 }
 0x149   :  { %695 = vmatpush2.msra.mxu0 %v624_v7 }
 0x14a   :  { %696 = vmatprep.subr.mxu0 %v847_v0 }
 0x14b   :  { %697 = vmatpush2.msra.mxu0 %v623_v8 }
 0x14c   :  { %698 = vmatprep.subr.mxu0 %v847_v0 }
 0x14d   :  { %699 = vmatpush2.msra.mxu0 %v622_v9 }
 0x1e6   :  { %v407_v15 = vpop.f32.mrf.mxu0 }
 0x1e7   :  { %v408_v16 = vadd.f32 %v407_v15, %v330_v13 }
 0x1e8   :  { %v409_v17 = vpop.f32.mrf.mxu0 }
 0x1e9   :  { %v414_v18 = vand.u32 2147483647, %v408_v16  ;;  %v410_v19 = vadd.f32 %v409_v17, %v334_v14  ;;  %v412_v39 = vmax.f32 %v408_v16, 0.0 }
 0x1eb   :  { %v416_v20 = vsub.f32 0.0, %v414_v18  ;;  %v415_v21 = vand.u32 2147483647, %v410_v19  ;;  %v413_v44 = vmax.f32 %v410_v19, 0.0 }
 0x1ed   :  { %v418_v22 = vmul.f32 1.442695, %v416_v20  ;;  %v417_v23 = vsub.f32 0.0, %v415_v21 }
 0x1ef   :  { %753 = vpow2.f32 %v418_v22  ;;  %v420_v24 = vmul.f32 1.442695, %v417_v23 }
 0x1f1   :  { %755 = vpow2.f32 %v420_v24 }
 0x1fc   :  { %v754_v25 = vpop.eup %753 }
 0x1fd   :  { %v422_v26 = vadd.f32 1.0, %v754_v25  ;;  %v425_v29 = vmul.f32 -0.5, %v754_v25  ;;  %v428_v32 = vand.u32 2147483647, %v754_v25 }
 0x1fe   :  { %v756_v27 = vpop.eup %755 }
 0x1ff   :  { %757 = vlog2.f32 %v422_v26  ;;  %v431_v28 = vadd.f32 1.0, %v756_v27  ;;  %v434_v30 = vmul.f32 -0.5, %v756_v27  ;;  %v426_v31 = vadd.f32 1.0, %v425_v29 }
 0x200   :  { %v437_v35 = vand.u32 2147483647, %v756_v27  ;;  %vm429_vm6 = vcmp.lt.f32.partialorder %v428_v32, 0.0004427343 }
 0x201   :  { %759 = vlog2.f32 %v431_v28  ;;  %v435_v33 = vadd.f32 1.0, %v434_v30  ;;  %v427_v37 = vmul.f32 %v754_v25, %v426_v31 }
 0x202   :  { %vm438_vm7 = vcmp.lt.f32.partialorder %v437_v35, 0.0004427343 }
 0x203   :  { %v436_v42 = vmul.f32 %v756_v27, %v435_v33 }
 0x20c   :  { %v758_v34 = vpop.eup %757 }
 0x20d   :  { %v424_v36 = vmul.f32 0.6931472, %v758_v34 }
 0x20e   :  { %v760_v38 = vpop.eup %759 }
 0x20f   :  { %v430_v40 = vsel %vm429_vm6, %v427_v37, %v424_v36  ;;  %v433_v41 = vmul.f32 0.6931472, %v760_v38 }
 0x210   :  { %v440_v43 = vadd.f32 %v430_v40, %v412_v39 }
 0x211   :  { %v439_v45 = vsel %vm438_vm7, %v436_v42, %v433_v41 }
 0x212   :  { %v441_v46 = vadd.f32 %v439_v45, %v413_v44  ;;  %761 = vtanh.f32 %v440_v43 }
 0x214   :  { %763 = vtanh.f32 %v441_v46  ;;  %v732_v46 = vld [vmem:[%s1056_s10] ss:$0 sm:$0xff] }
 0x21f   :  { %v762_v47 = vpop.eup %761 }
 0x220   :  { %v444_v50 = vmul.f32 %v762_v47, %v408_v16 }
 0x221   :  { %v764_v48 = vpop.eup %763 }
 0x222   :  { %v445_v49 = vmul.f32 %v764_v48, %v410_v19 }
 0x224   :  { %731 = vmatprep.mubr.msk.f32.mxu1 %vm337_vm5, %v445_v49 }
 0x225   :  { %566 = vmatmul.mubr.f32.vlgmr.msra.gmra.mxu1 %v444_v50 }
 0x2e5   :  { %v567_v13 = vpop.f32.mrf.mxu1 }
 0x2e6   :  { %v568_v14 = vadd.f32 %v567_v13, %v491_v11 }
 0x2e7   :  { %v569_v15 = vpop.f32.mrf.mxu1 }
 0x2e8   :  { %v574_v16 = vand.u32 2147483647, %v568_v14  ;;  %v570_v17 = vadd.f32 %v569_v15, %v495_v12  ;;  %v572_v34 = vmax.f32 %v568_v14, 0.0 }
 0x2ea   :  { %v576_v18 = vsub.f32 0.0, %v574_v16  ;;  %v575_v19 = vand.u32 2147483647, %v570_v17  ;;  %v573_v39 = vmax.f32 %v570_v17, 0.0 }
 0x2ec   :  { %v578_v20 = vmul.f32 1.442695, %v576_v18  ;;  %v577_v21 = vsub.f32 0.0, %v575_v19 }
 0x2ee   :  { %765 = vpow2.f32 %v578_v20  ;;  %v580_v0 = vmul.f32 1.442695, %v577_v21 }
 0x2f0   :  { %767 = vpow2.f32 %v580_v0 }
 0x2fb   :  { %v766_v22 = vpop.eup %765 }
 0x2fc   :  { %v582_v23 = vadd.f32 1.0, %v766_v22  ;;  %v585_v51 = vmul.f32 -0.5, %v766_v22  ;;  %v588_v27 = vand.u32 2147483647, %v766_v22 }
 0x2fd   :  { %v768_v24 = vpop.eup %767 }
 0x2fe   :  { %769 = vlog2.f32 %v582_v23  ;;  %v591_v25 = vadd.f32 1.0, %v768_v24  ;;  %v594_v54 = vmul.f32 -0.5, %v768_v24  ;;  %v586_v26 = vadd.f32 1.0, %v585_v51 }
 0x2ff   :  { %v597_v30 = vand.u32 2147483647, %v768_v24  ;;  %vm589_vm8 = vcmp.lt.f32.partialorder %v588_v27, 0.0004427343 }
 0x300   :  { %771 = vlog2.f32 %v591_v25  ;;  %v595_v28 = vadd.f32 1.0, %v594_v54  ;;  %v587_v32 = vmul.f32 %v766_v22, %v586_v26 }
 0x301   :  { %vm598_vm9 = vcmp.lt.f32.partialorder %v597_v30, 0.0004427343 }
 0x302   :  { %v596_v37 = vmul.f32 %v768_v24, %v595_v28 }
 0x30b   :  { %v770_v29 = vpop.eup %769 }
 0x30c   :  { %v584_v31 = vmul.f32 0.6931472, %v770_v29 }
 0x30d   :  { %v772_v33 = vpop.eup %771 }
 0x30e   :  { %v590_v35 = vsel %vm589_vm8, %v587_v32, %v584_v31  ;;  %v593_v36 = vmul.f32 0.6931472, %v772_v33 }
 0x30f   :  { %v600_v38 = vadd.f32 %v590_v35, %v572_v34 }
 0x310   :  { %v599_v40 = vsel %vm598_vm9, %v596_v37, %v593_v36 }
 0x311   :  { %v601_v41 = vadd.f32 %v599_v40, %v573_v39  ;;  %773 = vtanh.f32 %v600_v38 }
 0x313   :  { %775 = vtanh.f32 %v601_v41 }
 0x31e   :  { %v774_v42 = vpop.eup %773 }
 0x31f   :  { %v604_v45 = vmul.f32 %v774_v42, %v568_v14 }
 0x320   :  { %v776_v43 = vpop.eup %775 }
 0x321   :  { %v605_v44 = vmul.f32 %v776_v43, %v570_v17 }
 0x323   :  { %733 = vmatprep.mubr.msk.f32.mxu0 %vm337_vm5, %v605_v44 }
 0x324   :  { %701 = vmatmul.mubr.f32.vlgmr.msra.gmra.mxu0 %v604_v45 }
 0x3e4   :  { %v702_v47 = vpop.f32.mrf.mxu0 }
 0x3e5   :  { %v703_v48 = vadd.f32 %v732_v46, %v702_v47 }
 0x3e6   :  { %v704_v49 = vpop.f32.mrf.mxu0 }
 0x3e7   :  { %707 = vst.msk [vmem:[#allocation7] sm:$0xff] %vm706_vm10, %v703_v48 }
 0x3e8   :  { %828 = shalt.err (!%p825_p0)
}
 0x3e9   :  { %717 = dma.vmem_to_hbm [thread:$0]  %s715_s15, 128, %s1057_s11, [#allocation4]  }
 0x3ea   :  { %841 = dma.done.wait [#allocation4], 128  }
 0x3eb   :  { %842 = vsyncadd [#allocation4], 4294967168 }
 0x3ec   :  { %721 = vsyncpa [#allocation3], 1 }
 0x3ed   :  { %722 = vsyncpa [#allocation6], 1 }
 0x3ee   :  { %723 = vsyncpa [#allocation4], 1 }

</bundles_post_ra>
